<compile_context>
chip_gen: v6e
topology: v6e:2x2x1
jax: 0.10.0
libtpu: 0.0.40
codegen_flags: <defaults>
</compile_context>

<pallas_src>
import jax
import jax.numpy as jnp
from jax.experimental import pallas as pl
from jax.experimental.pallas import tpu as pltpu


_LANE = 128                       # lane width: keep tiled dims lane-dense
_MIN_KERNEL_DIM = 128             # below this, fall back to XLA transpose
_MAX_TILE_BYTES = 4 * 1024 * 1024   # per (TM, TN) tile byte budget
_MAX_STEP_BYTES = 8 * 1024 * 1024   # per grid step (incl. TB batching) budget


def _transpose_tile_kernel(x_ref, o_ref):
    # x_ref block: (TB, TM, TN)  ->  o_ref block: (TB, TN, TM)   (XLU transpose)
    # TODO(synk): try pltpu.einshape("bmn->bnm", ...) if v7x turns out XLU-bound.
    o_ref[...] = jnp.swapaxes(x_ref[...], 1, 2)


def _physical_vmem_bytes():
    """Per-generation physical VMEM (64 MiB v7x, 128 MiB v5e/v6e)."""
    try:
        info = pltpu.get_tpu_info()
        return int(getattr(info, "vmem_capacity_bytes", 64 << 20))
    except Exception:
        return 64 << 20  # conservative default (v7x-sized)


def _pick_tiles(d1, d2, itemsize, tile_budget_bytes):
    """Pick (tm, tn): full dims when they fit the budget, otherwise the largest
    square-ish 128-multiple tile within the dtype-aware byte budget.  When one
    dim is taken whole and small, the other dim uses the leftover budget
    (longer contiguous DMA runs — also satisfies the >=512 B run-length goal
    for bf16/int8 since the budget caps are >=1024 elements)."""
    elems = max(tile_budget_bytes // itemsize, _LANE * _LANE)
    cap = max(_LANE, (int(elems ** 0.5) // _LANE) * _LANE)

    tm = d1 if d1 <= cap else cap
    tn = d2 if d2 <= cap else cap

    def grow(fixed, other):
        t = max(_LANE, ((elems // max(fixed, 1)) // _LANE) * _LANE)
        return other if t >= other else t

    if tm == d1 and tn < d2:
        tn = grow(tm, d2)
    elif tn == d2 and tm < d1:
        tm = grow(tn, d1)
    return tm, tn


def pallas_transpose(x, dim1, dim2):
    """Equivalent of torch.transpose(x, dim1, dim2)."""
    nd = x.ndim
    d1 = dim1 % nd
    d2 = dim2 % nd
    if d1 == d2:
        return x
    lo, hi = sorted((d1, d2))
    if (lo, hi) != (nd - 2, nd - 1):
        # TODO(synk): only the trailing-pair swap is kerneled; general pairs
        # would need an in-kernel gather/permute layout.
        return jnp.swapaxes(x, d1, d2)

    *lead, D1, D2 = x.shape
    itemsize = jnp.dtype(x.dtype).itemsize
    B = 1
    for s in lead:
        B *= s

    # Small trailing dims cannot be lane-dense and per-step overhead dominates;
    # XLA's fused transpose/copy wins there.
    if D1 < _MIN_KERNEL_DIM or D2 < _MIN_KERNEL_DIM or B == 0:
        return jnp.swapaxes(x, d1, d2)

    x3 = x.reshape(B, D1, D2)  # reshape glue only, no data permutation

    # Per-generation budgets: 2x input + 2x output buffers must fit VMEM with
    # headroom for internal scratch (v7x: 64 MiB physical; v5e/v6e: 128 MiB).
    phys_vmem = _physical_vmem_bytes()
    usable = max(phys_vmem - (16 << 20), 16 << 20)
    step_budget = min(_MAX_STEP_BYTES, usable // 4)
    tile_budget = min(_MAX_TILE_BYTES, step_budget)

    tm, tn = _pick_tiles(D1, D2, itemsize, tile_budget)

    # Batch several [D1, D2] slabs per grid step when a single slab fits in one
    # tile, amortizing grid-step overhead (TB divides B exactly).
    tb = 1
    if tm == D1 and tn == D2:
        slab_bytes = D1 * D2 * itemsize
        tb = max(1, min(B, step_budget // max(slab_bytes, 1)))
        while B % tb:
            tb -= 1

    # Explicit VMEM limit: cover the double-buffered in+out footprint plus
    # headroom (the 16/32 MiB default scoped limit would gate large tiles).
    step_bytes = tb * tm * tn * itemsize
    vmem_limit = int(min(phys_vmem - (4 << 20),
                         max(32 << 20, 4 * step_bytes + (8 << 20))))

    # Innermost grid axis (i) walks the OUTPUT's last dim (D1 tiles) so
    # successive output writebacks are address-local in HBM.
    grid = (pl.cdiv(B, tb), pl.cdiv(D2, tn), pl.cdiv(D1, tm))

    out3 = pl.pallas_call(
        _transpose_tile_kernel,
        out_shape=jax.ShapeDtypeStruct((B, D2, D1), x.dtype),
        grid_spec=pltpu.PrefetchScalarGridSpec(
            num_scalar_prefetch=0,
            grid=grid,
            in_specs=[pl.BlockSpec((tb, tm, tn), lambda b, j, i: (b, i, j))],
            out_specs=pl.BlockSpec((tb, tn, tm), lambda b, j, i: (b, j, i)),
        ),
        compiler_params=pltpu.CompilerParams(
            dimension_semantics=("parallel", "parallel", "parallel"),
            vmem_limit_bytes=vmem_limit,
        ),
        cost_estimate=pl.CostEstimate(
            flops=0,
            transcendentals=0,
            bytes_accessed=2 * B * D1 * D2 * itemsize,
        ),
    )(x3)

    return out3.reshape(*lead, D2, D1)


if __name__ == "__main__":
    key = jax.random.PRNGKey(0)
    cases = [
        # (shape, dtype, dim1, dim2)
        ((2, 128, 256), jnp.float32, 1, 2),        # kernel path, slab batching
        ((2, 3, 128, 256), jnp.float32, -2, -1),   # 4-D, leading dims flattened
        ((1, 192, 320), jnp.float32, 1, 2),        # full non-128-multiple dims
        ((1, 256, 128), jnp.bfloat16, 1, 2),       # bf16, packing-aligned block
        ((1, 128, 2048), jnp.float32, 1, 2),       # rebalanced wide tile
        ((1, 1152, 1408), jnp.float32, 1, 2),      # tiled path w/ edge tiles
        ((2, 8, 32), jnp.float32, 1, 2),           # tiny trailing dims -> fallback
        ((2, 4, 16, 16), jnp.float32, 1, 2),       # non-trailing pair -> fallback
    ]
    keys = jax.random.split(key, len(cases))
    for k, (shape, dtype, dim1, dim2) in zip(keys, cases):
        x = jax.random.normal(k, shape, dtype=jnp.float32).astype(dtype)
        out = jax.block_until_ready(pallas_transpose(x, dim1, dim2))
        ref = jnp.swapaxes(x, dim1, dim2)
        assert out.shape == ref.shape, (shape, out.shape, ref.shape)
        assert out.dtype == ref.dtype, (shape, out.dtype, ref.dtype)
        assert jnp.array_equal(out, ref), f"mismatch vs reference for {shape}"
    print("KERNEL_OK")
</pallas_src>

<mosaic_0001>
module attributes {stable_mosaic.version = 11 : i64} {
  func.func @_transpose_tile_kernel(%arg0: i32, %arg1: i32, %arg2: i32, %arg3: memref<2x128x256xf32, #tpu.memory_space<vmem>>, %arg4: memref<2x256x128xf32, #tpu.memory_space<vmem>>) attributes {dimension_semantics = [#tpu.dimension_semantics<parallel>, #tpu.dimension_semantics<parallel>, #tpu.dimension_semantics<parallel>], iteration_bounds = array<i64: 1, 1, 1>, scalar_prefetch = 0 : i64, scratch_operands = 0 : i64, tpu.core_type = #tpu.core_type<tc>, window_params = [{transform_indices = @transform_0, window_bounds = array<i64: 2, 128, 256>}, {transform_indices = @transform_1, window_bounds = array<i64: 2, 256, 128>}]} {
    %c0 = arith.constant 0 : index
    %c0_0 = arith.constant 0 : index
    %c0_1 = arith.constant 0 : index
    %0 = vector.load %arg3[%c0, %c0_0, %c0_1] : memref<2x128x256xf32, #tpu.memory_space<vmem>>, vector<2x128x256xf32>
    %1 = tpu.transpose %0, [0, 2, 1] : vector<2x128x256xf32> -> vector<2x256x128xf32>
    %c0_2 = arith.constant 0 : index
    %c0_3 = arith.constant 0 : index
    %c0_4 = arith.constant 0 : index
    %2 = vector.load %arg4[%c0_2, %c0_3, %c0_4] : memref<2x256x128xf32, #tpu.memory_space<vmem>>, vector<2x256x128xf32>
    tpu.vector_store %arg4[%c0_2, %c0_3, %c0_4], %1 {strides = array<i32>} : memref<2x256x128xf32, #tpu.memory_space<vmem>>, vector<2x256x128xf32>,
    return
  }
  func.func @transform_0(%arg0: i32, %arg1: i32, %arg2: i32) -> (i32, i32, i32) {
    %c0_i32 = arith.constant 0 : i32
    return %arg0, %arg2, %arg1 : i32, i32, i32
  }
  func.func @transform_1(%arg0: i32, %arg1: i32, %arg2: i32) -> (i32, i32, i32) {
    %c0_i32 = arith.constant 0 : i32
    return %arg0, %arg1, %arg2 : i32, i32, i32
  }
}

</mosaic_0001>

<bundles_post_ra>
// kernel: tpu_custom_call.1
= control target key start
LH: loop header
LB: loop body
LE: loop exit
PB: predicated region body
PF: predicated region fallthrough
CT: control target
= control target key end

     0   :  { %6 = vsyncpa [#allocation3], 0  ;;  %s368_s0 = inlined_call_operand.hbm [shape: f32[2,128,256], index: 0, kind: input, shape index: {}]   ;;  %s369_s1 = inlined_call_operand.hbm [shape: f32[2,256,128], index: 1, kind: output, shape index: {}]  }
   0x1   :  { %7 = vsyncpa [#allocation4], 0  ;;  %s346_s6 = smov [#allocation2]  }
   0x2   :  { %s13_s7 = sshll.u32 %s346_s6, 4  ;;  %s14_s7 = int_to_ptr.vmem [resolvable:$true] %s13_s7 }
   0x3   :  { %s310_s8 = scalar_lea.vmem %s14_s7, 8192  ;;  %p315_p1 = scmp.lt.s32.totalorder %s14_s7, %s14_s7 }
   0x4   :  { %p311_p0 = scmp.ne.s32.totalorder %s14_s7, %s310_s8  ;;  %p316_p2 = scmp.lt.s32.totalorder %s310_s8, %s310_s8 }
   0x6   :  { %p317_p3 = por %p316_p2, %p315_p1 }
   0x8   :  { %p318_p4 = pnand %p317_p3, %p311_p0 }
   0xa   :  { %321 = shalt.err (!%p318_p4)
}
   0xb   :  { %s347_s9 = smov 256   ;;  %s348_s10 = smov 16  }
   0xc   :  { %19 = dma.hbm_to_vmem [thread:$0]  %s368_s0, 8192, %s14_s7, [#allocation3], %s347_s9, %s347_s9, %s348_s10  }
   0xd   :  { %342 = dma.done.wait [#allocation3], 8192  }
   0xe   :  { %343 = vsyncadd [#allocation3], 4294959104  ;;  %v24_v0 = vld [vmem:[#allocation2 + $0x8] sm:$0xff]  ;;  %v23_v1 = vld [vmem:[#allocation2] sm:$0xff]  ;;  %s349_s0 = smov [#allocation5]  }
   0xf   :  { %119 = vxpose.xlu1.b32.start [1/16] %v24_v0, 128  ;;  %87 = vxpose.xlu0.b32.start [1/16] %v23_v1, 128  ;;  %v26_v2 = vld [vmem:[#allocation2 + $0x18] sm:$0xff]  ;;  %v25_v3 = vld [vmem:[#allocation2 + $0x10] sm:$0xff]  ;;  %v28_v4 = vld [vmem:[#allocation2 + $0x28] sm:$0xff]  ;;  %s284_s13 = sshll.u32 %s349_s0, 4  ;;  %s285_s13 = int_to_ptr.vmem [resolvable:$true] %s284_s13 }
  0x10   :  { %v27_v5 = vld [vmem:[#allocation2 + $0x20] sm:$0xff]  ;;  %v30_v6 = vld [vmem:[#allocation2 + $0x38] sm:$0xff]  ;;  %v29_v7 = vld [vmem:[#allocation2 + $0x30] sm:$0xff]  ;;  %s322_s14 = scalar_lea.vmem %s285_s13, 8192  ;;  %p327_p6 = scmp.lt.s32.totalorder %s285_s13, %s285_s13 }
  0x11   :  { %v32_v8 = vld [vmem:[#allocation2 + $0x48] sm:$0xff]  ;;  %v31_v9 = vld [vmem:[#allocation2 + $0x40] sm:$0xff]  ;;  %v34_v10 = vld [vmem:[#allocation2 + $0x58] sm:$0xff]  ;;  %p323_p5 = scmp.ne.s32.totalorder %s285_s13, %s322_s14  ;;  %p328_p7 = scmp.lt.s32.totalorder %s322_s14, %s322_s14 }
  0x12   :  { %v33_v11 = vld [vmem:[#allocation2 + $0x50] sm:$0xff]  ;;  %v36_v12 = vld [vmem:[#allocation2 + $0x68] sm:$0xff]  ;;  %v35_v13 = vld [vmem:[#allocation2 + $0x60] sm:$0xff] }
  0x13   :  { %120 = vxpose.xlu1.b32.cont [2/16] %v26_v2, 128  ;;  %88 = vxpose.xlu0.b32.cont [2/16] %v25_v3, 128  ;;  %v38_v14 = vld [vmem:[#allocation2 + $0x78] sm:$0xff]  ;;  %v37_v15 = vld [vmem:[#allocation2 + $0x70] sm:$0xff]  ;;  %v40_v16 = vld [vmem:[#allocation2 + $0x88] sm:$0xff]  ;;  %p329_p8 = por %p328_p7, %p327_p6 }
  0x14   :  { %v39_v17 = vld [vmem:[#allocation2 + $0x80] sm:$0xff]  ;;  %v42_v18 = vld [vmem:[#allocation2 + $0x98] sm:$0xff]  ;;  %v41_v19 = vld [vmem:[#allocation2 + $0x90] sm:$0xff] }
  0x15   :  { %v44_v20 = vld [vmem:[#allocation2 + $0xa8] sm:$0xff]  ;;  %v43_v21 = vld [vmem:[#allocation2 + $0xa0] sm:$0xff]  ;;  %v46_v22 = vld [vmem:[#allocation2 + $0xb8] sm:$0xff]  ;;  %p330_p9 = pnand %p329_p8, %p323_p5 }
  0x16   :  { %v45_v23 = vld [vmem:[#allocation2 + $0xb0] sm:$0xff]  ;;  %v48_v24 = vld [vmem:[#allocation2 + $0xc8] sm:$0xff]  ;;  %v47_v25 = vld [vmem:[#allocation2 + $0xc0] sm:$0xff] }
  0x17   :  { %121 = vxpose.xlu1.b32.cont [3/16] %v28_v4, 128  ;;  %89 = vxpose.xlu0.b32.cont [3/16] %v27_v5, 128  ;;  %v50_v26 = vld [vmem:[#allocation2 + $0xd8] sm:$0xff]  ;;  %v49_v27 = vld [vmem:[#allocation2 + $0xd0] sm:$0xff]  ;;  %v52_v28 = vld [vmem:[#allocation2 + $0xe8] sm:$0xff] }
  0x18   :  { %v51_v29 = vld [vmem:[#allocation2 + $0xe0] sm:$0xff]  ;;  %v54_v30 = vld [vmem:[#allocation2 + $0xf8] sm:$0xff]  ;;  %v53_v31 = vld [vmem:[#allocation2 + $0xf0] sm:$0xff] }
  0x19   :  { %v56_v32 = vld [vmem:[#allocation2 + $0x108] sm:$0xff]  ;;  %v55_v33 = vld [vmem:[#allocation2 + $0x100] sm:$0xff]  ;;  %v58_v34 = vld [vmem:[#allocation2 + $0x118] sm:$0xff] }
  0x1a   :  { %v57_v35 = vld [vmem:[#allocation2 + $0x110] sm:$0xff]  ;;  %v60_v36 = vld [vmem:[#allocation2 + $0x128] sm:$0xff]  ;;  %v59_v37 = vld [vmem:[#allocation2 + $0x120] sm:$0xff] }
  0x1b   :  { %122 = vxpose.xlu1.b32.cont [4/16] %v30_v6, 128  ;;  %90 = vxpose.xlu0.b32.cont [4/16] %v29_v7, 128  ;;  %v62_v38 = vld [vmem:[#allocation2 + $0x138] sm:$0xff]  ;;  %v61_v39 = vld [vmem:[#allocation2 + $0x130] sm:$0xff]  ;;  %v64_v40 = vld [vmem:[#allocation2 + $0x148] sm:$0xff] }
  0x1c   :  { %v63_v41 = vld [vmem:[#allocation2 + $0x140] sm:$0xff]  ;;  %v66_v42 = vld [vmem:[#allocation2 + $0x158] sm:$0xff]  ;;  %v65_v43 = vld [vmem:[#allocation2 + $0x150] sm:$0xff] }
  0x1d   :  { %v68_v44 = vld [vmem:[#allocation2 + $0x168] sm:$0xff]  ;;  %v67_v45 = vld [vmem:[#allocation2 + $0x160] sm:$0xff]  ;;  %v70_v46 = vld [vmem:[#allocation2 + $0x178] sm:$0xff] }
  0x1e   :  { %v69_v47 = vld [vmem:[#allocation2 + $0x170] sm:$0xff]  ;;  %v72_v48 = vld [vmem:[#allocation2 + $0x188] sm:$0xff]  ;;  %v71_v49 = vld [vmem:[#allocation2 + $0x180] sm:$0xff] }
  0x1f   :  { %123 = vxpose.xlu1.b32.cont [5/16] %v32_v8, 128  ;;  %91 = vxpose.xlu0.b32.cont [5/16] %v31_v9, 128  ;;  %v74_v50 = vld [vmem:[#allocation2 + $0x198] sm:$0xff]  ;;  %v73_v51 = vld [vmem:[#allocation2 + $0x190] sm:$0xff]  ;;  %v76_v52 = vld [vmem:[#allocation2 + $0x1a8] sm:$0xff] }
  0x20   :  { %v75_v53 = vld [vmem:[#allocation2 + $0x1a0] sm:$0xff]  ;;  %v78_v54 = vld [vmem:[#allocation2 + $0x1b8] sm:$0xff]  ;;  %v77_v55 = vld [vmem:[#allocation2 + $0x1b0] sm:$0xff] }
  0x21   :  { %v80_v56 = vld [vmem:[#allocation2 + $0x1c8] sm:$0xff]  ;;  %v79_v57 = vld [vmem:[#allocation2 + $0x1c0] sm:$0xff]  ;;  %v82_v58 = vld [vmem:[#allocation2 + $0x1d8] sm:$0xff] }
  0x22   :  { %v81_v59 = vld [vmem:[#allocation2 + $0x1d0] sm:$0xff]  ;;  %v84_v60 = vld [vmem:[#allocation2 + $0x1e8] sm:$0xff]  ;;  %v83_v61 = vld [vmem:[#allocation2 + $0x1e0] sm:$0xff] }
  0x23   :  { %124 = vxpose.xlu1.b32.cont [6/16] %v34_v10, 128  ;;  %92 = vxpose.xlu0.b32.cont [6/16] %v33_v11, 128  ;;  %v86_v62 = vld [vmem:[#allocation2 + $0x1f8] sm:$0xff]  ;;  %v85_v63 = vld [vmem:[#allocation2 + $0x1f0] sm:$0xff] }
  0x27   :  { %125 = vxpose.xlu1.b32.cont [7/16] %v36_v12, 128  ;;  %93 = vxpose.xlu0.b32.cont [7/16] %v35_v13, 128 }
  0x2b   :  { %126 = vxpose.xlu1.b32.cont [8/16] %v38_v14, 128  ;;  %94 = vxpose.xlu0.b32.cont [8/16] %v37_v15, 128 }
  0x2f   :  { %127 = vxpose.xlu1.b32.cont [9/16] %v40_v16, 128  ;;  %95 = vxpose.xlu0.b32.cont [9/16] %v39_v17, 128 }
  0x33   :  { %128 = vxpose.xlu1.b32.cont [10/16] %v42_v18, 128  ;;  %96 = vxpose.xlu0.b32.cont [10/16] %v41_v19, 128 }
  0x37   :  { %129 = vxpose.xlu1.b32.cont [11/16] %v44_v20, 128  ;;  %97 = vxpose.xlu0.b32.cont [11/16] %v43_v21, 128 }
  0x3b   :  { %130 = vxpose.xlu1.b32.cont [12/16] %v46_v22, 128  ;;  %98 = vxpose.xlu0.b32.cont [12/16] %v45_v23, 128 }
  0x3f   :  { %131 = vxpose.xlu1.b32.cont [13/16] %v48_v24, 128  ;;  %99 = vxpose.xlu0.b32.cont [13/16] %v47_v25, 128 }
  0x43   :  { %132 = vxpose.xlu1.b32.cont [14/16] %v50_v26, 128  ;;  %100 = vxpose.xlu0.b32.cont [14/16] %v49_v27, 128 }
  0x47   :  { %133 = vxpose.xlu1.b32.cont [15/16] %v52_v28, 128  ;;  %101 = vxpose.xlu0.b32.cont [15/16] %v51_v29, 128 }
  0x4b   :  { %134 = vxpose.xlu1.b32.end [16/16] %v54_v30, 128  ;;  %102 = vxpose.xlu0.b32.end [16/16] %v53_v31, 128 }
  0x4f   :  { %183 = vxpose.xlu1.b32.start [1/16] %v56_v32, 128  ;;  %151 = vxpose.xlu0.b32.start [1/16] %v55_v33, 128 }
  0x53   :  { %184 = vxpose.xlu1.b32.cont [2/16] %v58_v34, 128  ;;  %152 = vxpose.xlu0.b32.cont [2/16] %v57_v35, 128 }
  0x57   :  { %185 = vxpose.xlu1.b32.cont [3/16] %v60_v36, 128  ;;  %153 = vxpose.xlu0.b32.cont [3/16] %v59_v37, 128 }
  0x5b   :  { %186 = vxpose.xlu1.b32.cont [4/16] %v62_v38, 128  ;;  %154 = vxpose.xlu0.b32.cont [4/16] %v61_v39, 128 }
  0x5f   :  { %187 = vxpose.xlu1.b32.cont [5/16] %v64_v40, 128  ;;  %155 = vxpose.xlu0.b32.cont [5/16] %v63_v41, 128 }
  0x63   :  { %188 = vxpose.xlu1.b32.cont [6/16] %v66_v42, 128  ;;  %156 = vxpose.xlu0.b32.cont [6/16] %v65_v43, 128 }
  0x67   :  { %189 = vxpose.xlu1.b32.cont [7/16] %v68_v44, 128  ;;  %157 = vxpose.xlu0.b32.cont [7/16] %v67_v45, 128 }
  0x6b   :  { %190 = vxpose.xlu1.b32.cont [8/16] %v70_v46, 128  ;;  %158 = vxpose.xlu0.b32.cont [8/16] %v69_v47, 128 }
  0x6f   :  { %191 = vxpose.xlu1.b32.cont [9/16] %v72_v48, 128  ;;  %159 = vxpose.xlu0.b32.cont [9/16] %v71_v49, 128 }
  0x73   :  { %192 = vxpose.xlu1.b32.cont [10/16] %v74_v50, 128  ;;  %160 = vxpose.xlu0.b32.cont [10/16] %v73_v51, 128 }
  0x77   :  { %193 = vxpose.xlu1.b32.cont [11/16] %v76_v52, 128  ;;  %161 = vxpose.xlu0.b32.cont [11/16] %v75_v53, 128 }
  0x7b   :  { %194 = vxpose.xlu1.b32.cont [12/16] %v78_v54, 128  ;;  %162 = vxpose.xlu0.b32.cont [12/16] %v77_v55, 128 }
  0x7f   :  { %195 = vxpose.xlu1.b32.cont [13/16] %v80_v56, 128  ;;  %163 = vxpose.xlu0.b32.cont [13/16] %v79_v57, 128 }
  0x83   :  { %196 = vxpose.xlu1.b32.cont [14/16] %v82_v58, 128  ;;  %164 = vxpose.xlu0.b32.cont [14/16] %v81_v59, 128 }
  0x87   :  { %197 = vxpose.xlu1.b32.cont [15/16] %v84_v60, 128  ;;  %165 = vxpose.xlu0.b32.cont [15/16] %v83_v61, 128 }
  0x8b   :  { %198 = vxpose.xlu1.b32.end [16/16] %v86_v62, 128  ;;  %v135_v0 = vpop.trf.xlu1  ;;  %166 = vxpose.xlu0.b32.end [16/16] %v85_v63, 128  ;;  %v103_v1 = vpop.trf.xlu0 }
  0x8c   :  { %231 = vst [vmem:[#allocation5 + $0x80] sm:$0xff] %v135_v0  ;;  %215 = vst [vmem:[#allocation5] sm:$0xff] %v103_v1 }
  0x8f   :  { %v136_v2 = vpop.trf.xlu1  ;;  %v104_v3 = vpop.trf.xlu0 }
  0x90   :  { %232 = vst [vmem:[#allocation5 + $0x88] sm:$0xff] %v136_v2  ;;  %216 = vst [vmem:[#allocation5 + $0x8] sm:$0xff] %v104_v3 }
  0x93   :  { %v137_v4 = vpop.trf.xlu1  ;;  %v105_v5 = vpop.trf.xlu0 }
  0x94   :  { %233 = vst [vmem:[#allocation5 + $0x90] sm:$0xff] %v137_v4  ;;  %217 = vst [vmem:[#allocation5 + $0x10] sm:$0xff] %v105_v5 }
  0x97   :  { %v138_v6 = vpop.trf.xlu1  ;;  %v106_v7 = vpop.trf.xlu0 }
  0x98   :  { %234 = vst [vmem:[#allocation5 + $0x98] sm:$0xff] %v138_v6  ;;  %218 = vst [vmem:[#allocation5 + $0x18] sm:$0xff] %v106_v7 }
  0x9b   :  { %v139_v8 = vpop.trf.xlu1  ;;  %v107_v9 = vpop.trf.xlu0 }
  0x9c   :  { %235 = vst [vmem:[#allocation5 + $0xa0] sm:$0xff] %v139_v8  ;;  %219 = vst [vmem:[#allocation5 + $0x20] sm:$0xff] %v107_v9 }
  0x9f   :  { %v140_v10 = vpop.trf.xlu1  ;;  %v108_v11 = vpop.trf.xlu0 }
  0xa0   :  { %236 = vst [vmem:[#allocation5 + $0xa8] sm:$0xff] %v140_v10  ;;  %220 = vst [vmem:[#allocation5 + $0x28] sm:$0xff] %v108_v11 }
  0xa3   :  { %v141_v12 = vpop.trf.xlu1  ;;  %v109_v13 = vpop.trf.xlu0 }
  0xa4   :  { %237 = vst [vmem:[#allocation5 + $0xb0] sm:$0xff] %v141_v12  ;;  %221 = vst [vmem:[#allocation5 + $0x30] sm:$0xff] %v109_v13 }
  0xa7   :  { %v142_v14 = vpop.trf.xlu1  ;;  %v110_v15 = vpop.trf.xlu0 }
  0xa8   :  { %238 = vst [vmem:[#allocation5 + $0xb8] sm:$0xff] %v142_v14  ;;  %222 = vst [vmem:[#allocation5 + $0x38] sm:$0xff] %v110_v15 }
  0xab   :  { %v143_v16 = vpop.trf.xlu1  ;;  %v111_v17 = vpop.trf.xlu0 }
  0xac   :  { %239 = vst [vmem:[#allocation5 + $0xc0] sm:$0xff] %v143_v16  ;;  %223 = vst [vmem:[#allocation5 + $0x40] sm:$0xff] %v111_v17 }
  0xaf   :  { %v144_v18 = vpop.trf.xlu1  ;;  %v112_v19 = vpop.trf.xlu0 }
  0xb0   :  { %240 = vst [vmem:[#allocation5 + $0xc8] sm:$0xff] %v144_v18  ;;  %224 = vst [vmem:[#allocation5 + $0x48] sm:$0xff] %v112_v19 }
  0xb3   :  { %v145_v20 = vpop.trf.xlu1  ;;  %v113_v21 = vpop.trf.xlu0 }
  0xb4   :  { %241 = vst [vmem:[#allocation5 + $0xd0] sm:$0xff] %v145_v20  ;;  %225 = vst [vmem:[#allocation5 + $0x50] sm:$0xff] %v113_v21 }
  0xb7   :  { %v146_v22 = vpop.trf.xlu1  ;;  %v114_v23 = vpop.trf.xlu0 }
  0xb8   :  { %242 = vst [vmem:[#allocation5 + $0xd8] sm:$0xff] %v146_v22  ;;  %226 = vst [vmem:[#allocation5 + $0x58] sm:$0xff] %v114_v23 }
  0xbb   :  { %v147_v24 = vpop.trf.xlu1  ;;  %v115_v25 = vpop.trf.xlu0 }
  0xbc   :  { %243 = vst [vmem:[#allocation5 + $0xe0] sm:$0xff] %v147_v24  ;;  %227 = vst [vmem:[#allocation5 + $0x60] sm:$0xff] %v115_v25 }
  0xbf   :  { %v148_v26 = vpop.trf.xlu1  ;;  %v116_v27 = vpop.trf.xlu0 }
  0xc0   :  { %244 = vst [vmem:[#allocation5 + $0xe8] sm:$0xff] %v148_v26  ;;  %228 = vst [vmem:[#allocation5 + $0x68] sm:$0xff] %v116_v27 }
  0xc3   :  { %v149_v28 = vpop.trf.xlu1  ;;  %v117_v29 = vpop.trf.xlu0 }
  0xc4   :  { %245 = vst [vmem:[#allocation5 + $0xf0] sm:$0xff] %v149_v28  ;;  %229 = vst [vmem:[#allocation5 + $0x70] sm:$0xff] %v117_v29 }
  0xc7   :  { %v150_v30 = vpop.trf.xlu1  ;;  %v118_v31 = vpop.trf.xlu0 }
  0xc8   :  { %246 = vst [vmem:[#allocation5 + $0xf8] sm:$0xff] %v150_v30  ;;  %230 = vst [vmem:[#allocation5 + $0x78] sm:$0xff] %v118_v31 }
  0xcb   :  { %v199_v32 = vpop.trf.xlu1  ;;  %v167_v33 = vpop.trf.xlu0 }
  0xcc   :  { %263 = vst [vmem:[#allocation5 + $0x180] sm:$0xff] %v199_v32  ;;  %247 = vst [vmem:[#allocation5 + $0x100] sm:$0xff] %v167_v33 }
  0xcf   :  { %v200_v34 = vpop.trf.xlu1  ;;  %v168_v35 = vpop.trf.xlu0 }
  0xd0   :  { %264 = vst [vmem:[#allocation5 + $0x188] sm:$0xff] %v200_v34  ;;  %248 = vst [vmem:[#allocation5 + $0x108] sm:$0xff] %v168_v35 }
  0xd3   :  { %v201_v36 = vpop.trf.xlu1  ;;  %v169_v37 = vpop.trf.xlu0 }
  0xd4   :  { %265 = vst [vmem:[#allocation5 + $0x190] sm:$0xff] %v201_v36  ;;  %249 = vst [vmem:[#allocation5 + $0x110] sm:$0xff] %v169_v37 }
  0xd7   :  { %v202_v38 = vpop.trf.xlu1  ;;  %v170_v39 = vpop.trf.xlu0 }
  0xd8   :  { %266 = vst [vmem:[#allocation5 + $0x198] sm:$0xff] %v202_v38  ;;  %250 = vst [vmem:[#allocation5 + $0x118] sm:$0xff] %v170_v39 }
  0xdb   :  { %v203_v40 = vpop.trf.xlu1  ;;  %v171_v41 = vpop.trf.xlu0 }
  0xdc   :  { %267 = vst [vmem:[#allocation5 + $0x1a0] sm:$0xff] %v203_v40  ;;  %251 = vst [vmem:[#allocation5 + $0x120] sm:$0xff] %v171_v41 }
  0xdf   :  { %v204_v42 = vpop.trf.xlu1  ;;  %v172_v43 = vpop.trf.xlu0 }
  0xe0   :  { %268 = vst [vmem:[#allocation5 + $0x1a8] sm:$0xff] %v204_v42  ;;  %252 = vst [vmem:[#allocation5 + $0x128] sm:$0xff] %v172_v43 }
  0xe3   :  { %v205_v44 = vpop.trf.xlu1  ;;  %v173_v45 = vpop.trf.xlu0 }
  0xe4   :  { %269 = vst [vmem:[#allocation5 + $0x1b0] sm:$0xff] %v205_v44  ;;  %253 = vst [vmem:[#allocation5 + $0x130] sm:$0xff] %v173_v45 }
  0xe7   :  { %v206_v46 = vpop.trf.xlu1  ;;  %v174_v47 = vpop.trf.xlu0 }
  0xe8   :  { %270 = vst [vmem:[#allocation5 + $0x1b8] sm:$0xff] %v206_v46  ;;  %254 = vst [vmem:[#allocation5 + $0x138] sm:$0xff] %v174_v47 }
  0xeb   :  { %v207_v48 = vpop.trf.xlu1  ;;  %v175_v49 = vpop.trf.xlu0 }
  0xec   :  { %271 = vst [vmem:[#allocation5 + $0x1c0] sm:$0xff] %v207_v48  ;;  %255 = vst [vmem:[#allocation5 + $0x140] sm:$0xff] %v175_v49 }
  0xef   :  { %v208_v50 = vpop.trf.xlu1  ;;  %v176_v51 = vpop.trf.xlu0 }
  0xf0   :  { %272 = vst [vmem:[#allocation5 + $0x1c8] sm:$0xff] %v208_v50  ;;  %256 = vst [vmem:[#allocation5 + $0x148] sm:$0xff] %v176_v51 }
  0xf3   :  { %v209_v52 = vpop.trf.xlu1  ;;  %v177_v53 = vpop.trf.xlu0 }
  0xf4   :  { %273 = vst [vmem:[#allocation5 + $0x1d0] sm:$0xff] %v209_v52  ;;  %257 = vst [vmem:[#allocation5 + $0x150] sm:$0xff] %v177_v53 }
  0xf7   :  { %v210_v54 = vpop.trf.xlu1  ;;  %v178_v55 = vpop.trf.xlu0 }
  0xf8   :  { %274 = vst [vmem:[#allocation5 + $0x1d8] sm:$0xff] %v210_v54  ;;  %258 = vst [vmem:[#allocation5 + $0x158] sm:$0xff] %v178_v55 }
  0xfb   :  { %v211_v56 = vpop.trf.xlu1  ;;  %v179_v57 = vpop.trf.xlu0 }
  0xfc   :  { %275 = vst [vmem:[#allocation5 + $0x1e0] sm:$0xff] %v211_v56  ;;  %259 = vst [vmem:[#allocation5 + $0x160] sm:$0xff] %v179_v57 }
  0xff   :  { %v212_v58 = vpop.trf.xlu1  ;;  %v180_v59 = vpop.trf.xlu0 }
 0x100   :  { %276 = vst [vmem:[#allocation5 + $0x1e8] sm:$0xff] %v212_v58  ;;  %260 = vst [vmem:[#allocation5 + $0x168] sm:$0xff] %v180_v59 }
 0x103   :  { %v213_v60 = vpop.trf.xlu1  ;;  %v181_v61 = vpop.trf.xlu0 }
 0x104   :  { %277 = vst [vmem:[#allocation5 + $0x1f0] sm:$0xff] %v213_v60  ;;  %261 = vst [vmem:[#allocation5 + $0x170] sm:$0xff] %v181_v61 }
 0x107   :  { %v214_v62 = vpop.trf.xlu1  ;;  %v182_v63 = vpop.trf.xlu0 }
 0x108   :  { %278 = vst [vmem:[#allocation5 + $0x1f8] sm:$0xff] %v214_v62  ;;  %262 = vst [vmem:[#allocation5 + $0x178] sm:$0xff] %v182_v63 }
 0x109   :  { %333 = shalt.err (!%p330_p9)
}
 0x10a   :  { %s350_s15 = smov 128   ;;  %s351_s16 = smov 8  }
 0x10b   :  { %290 = dma.vmem_to_hbm [thread:$0]  %s285_s13, 8192, %s369_s1, [#allocation4], %s350_s15, %s350_s15, %s351_s16  }
 0x10c   :  { %344 = dma.done.wait [#allocation4], 8192  }
 0x10d   :  { %345 = vsyncadd [#allocation4], 4294959104 }
 0x10e   :  { %294 = vsyncpa [#allocation3], 1 }
 0x10f   :  { %295 = vsyncpa [#allocation4], 1 }

</bundles_post_ra>
